<compile_context>
chip_gen: v7x
topology: tpu7x:2x2x1
jax: 0.10.0
libtpu: 0.0.40
codegen_flags: <defaults>
</compile_context>

<pallas_src>
import functools

import jax
import jax.numpy as jnp
from jax.experimental import pallas as pl
from jax.experimental.pallas import tpu as pltpu

BN_EPS = 1e-5
LANE = 128
VMEM_LIMIT = 64 * 1024 * 1024


def _round_up(x, m):
    return ((x + m - 1) // m) * m


def _pick(dim, candidates):
    """Largest candidate tile that divides `dim` (dim is a multiple of 128)."""
    for c in candidates:
        if dim % c == 0:
            return c
    return dim


# --------------------------------------------------------------------------
# Pallas kernel 1: tiled matmul + fused bias (+ optional ReLU)
#   used for the 2x2/stride-2 ConvTranspose (pure channel mixing per pixel).
# --------------------------------------------------------------------------
@functools.lru_cache(maxsize=None)
def _build_matmul(Mp, Kp, Np, tm, tn, tk, relu, out_dtype_name):
    out_dtype = jnp.dtype(out_dtype_name)
    nk = Kp // tk

    cost = pl.CostEstimate(
        flops=2 * Mp * Kp * Np,
        transcendentals=0,
        bytes_accessed=2 * (Mp * Kp + Kp * Np) + 4 * Np
        + Mp * Np * out_dtype.itemsize)

    if nk == 1:
        # Single K step: no VMEM accumulator round-trip needed.
        def kernel(a_ref, b_ref, t_ref, o_ref):
            y = jnp.dot(a_ref[...], b_ref[...],
                        preferred_element_type=jnp.float32)
            y = y + t_ref[...]
            if relu:
                y = jnp.maximum(y, 0.0)
            o_ref[...] = y.astype(o_ref.dtype)

        grid_spec = pltpu.PrefetchScalarGridSpec(
            num_scalar_prefetch=0,
            grid=(Mp // tm, Np // tn),
            in_specs=[
                pl.BlockSpec((tm, Kp), lambda i, j: (i, 0)),
                pl.BlockSpec((Kp, tn), lambda i, j: (0, j)),
                pl.BlockSpec((1, tn), lambda i, j: (0, j)),
            ],
            out_specs=pl.BlockSpec((tm, tn), lambda i, j: (i, j)),
        )
        dims = ("parallel", "parallel")
    else:
        def kernel(a_ref, b_ref, t_ref, o_ref, acc_ref):
            @pl.when(pl.program_id(2) == 0)
            def _init():
                acc_ref[...] = jnp.zeros_like(acc_ref)

            acc_ref[...] += jnp.dot(a_ref[...], b_ref[...],
                                    preferred_element_type=jnp.float32)

            @pl.when(pl.program_id(2) == pl.num_programs(2) - 1)
            def _finish():
                y = acc_ref[...] + t_ref[...]
                if relu:
                    y = jnp.maximum(y, 0.0)
                o_ref[...] = y.astype(o_ref.dtype)

        grid_spec = pltpu.PrefetchScalarGridSpec(
            num_scalar_prefetch=0,
            grid=(Mp // tm, Np // tn, nk),
            in_specs=[
                pl.BlockSpec((tm, tk), lambda i, j, k: (i, k)),
                pl.BlockSpec((tk, tn), lambda i, j, k: (k, j)),
                pl.BlockSpec((1, tn), lambda i, j, k: (0, j)),
            ],
            out_specs=pl.BlockSpec((tm, tn), lambda i, j, k: (i, j)),
            scratch_shapes=[pltpu.VMEM((tm, tn), jnp.float32)],
        )
        dims = ("parallel", "parallel", "arbitrary")

    call = pl.pallas_call(
        kernel,
        out_shape=jax.ShapeDtypeStruct((Mp, Np), out_dtype),
        grid_spec=grid_spec,
        compiler_params=pltpu.CompilerParams(
            dimension_semantics=dims, vmem_limit_bytes=VMEM_LIMIT),
        cost_estimate=cost,
    )
    return jax.jit(call)


def matmul_bias(a, b_packed, bias_packed, *, relu=False, out_dtype=jnp.bfloat16):
    """out = [relu](A @ B + bias).  B/bias are pre-packed, pre-padded (bf16/f32)."""
    M, K = a.shape
    Kp, Np = b_packed.shape
    tm = min(256, _round_up(M, 8))
    Mp = _round_up(M, tm)
    tn = _pick(Np, (256, 128))
    tk = _pick(Kp, (512, 256, 128))
    a_p = jnp.pad(a.astype(jnp.bfloat16), ((0, Mp - M), (0, Kp - K)))
    call = _build_matmul(Mp, Kp, Np, tm, tn, tk, bool(relu),
                         jnp.dtype(out_dtype).name)
    return call(a_p, b_packed, bias_packed)[:M]


# --------------------------------------------------------------------------
# Pallas kernel 2: 3x3 / stride-1 / pad-1 conv on NHWC with fused BN + ReLU.
#   No im2col: the padded (H+2, W+2, tk) activation tile lives in VMEM and the
#   nine tap matmuls accumulate into f32.
# --------------------------------------------------------------------------
@functools.lru_cache(maxsize=None)
def _build_conv3x3(N, H, W, Cinp, Coutp, tn, tk, relu, out_dtype_name):
    out_dtype = jnp.dtype(out_dtype_name)
    HW = H * W
    nk = Cinp // tk

    cost = pl.CostEstimate(
        flops=2 * N * HW * 9 * Cinp * Coutp,
        transcendentals=0,
        bytes_accessed=2 * N * (H + 2) * (W + 2) * Cinp
        + 2 * 9 * Cinp * Coutp + 4 * Coutp
        + N * HW * Coutp * out_dtype.itemsize)

    def _taps_matmul(x_ref, w_ref):
        psum = None
        for tap in range(9):
            ki, kj = divmod(tap, 3)
            a = x_ref[0, ki:ki + H, kj:kj + W, :].reshape(HW, tk)
            d = jnp.dot(a, w_ref[tap], preferred_element_type=jnp.float32)
            psum = d if psum is None else psum + d
        return psum

    if nk == 1:
        # Whole Cin reduction in one grid step: write the epilogue directly.
        def kernel(x_ref, w_ref, t_ref, o_ref):
            y = _taps_matmul(x_ref, w_ref) + t_ref[...]
            if relu:
                y = jnp.maximum(y, 0.0)
            o_ref[0] = y.astype(o_ref.dtype)

        grid_spec = pltpu.PrefetchScalarGridSpec(
            num_scalar_prefetch=0,
            grid=(N, Coutp // tn),
            in_specs=[
                pl.BlockSpec((1, H + 2, W + 2, Cinp), lambda b, j: (b, 0, 0, 0)),
                pl.BlockSpec((9, Cinp, tn), lambda b, j: (0, 0, j)),
                pl.BlockSpec((1, tn), lambda b, j: (0, j)),
            ],
            out_specs=pl.BlockSpec((1, HW, tn), lambda b, j: (b, 0, j)),
        )
        dims = ("parallel", "parallel")
        scratch_note = None
    else:
        def kernel(x_ref, w_ref, t_ref, o_ref, acc_ref):
            @pl.when(pl.program_id(2) == 0)
            def _init():
                acc_ref[...] = jnp.zeros_like(acc_ref)

            acc_ref[...] += _taps_matmul(x_ref, w_ref)

            @pl.when(pl.program_id(2) == pl.num_programs(2) - 1)
            def _finish():
                y = acc_ref[...] + t_ref[...]
                if relu:
                    y = jnp.maximum(y, 0.0)
                o_ref[0] = y.astype(o_ref.dtype)

        grid_spec = pltpu.PrefetchScalarGridSpec(
            num_scalar_prefetch=0,
            grid=(N, Coutp // tn, nk),
            in_specs=[
                pl.BlockSpec((1, H + 2, W + 2, tk), lambda b, j, k: (b, 0, 0, k)),
                pl.BlockSpec((9, tk, tn), lambda b, j, k: (0, k, j)),
                pl.BlockSpec((1, tn), lambda b, j, k: (0, j)),
            ],
            out_specs=pl.BlockSpec((1, HW, tn), lambda b, j, k: (b, 0, j)),
            scratch_shapes=[pltpu.VMEM((HW, tn), jnp.float32)],
        )
        dims = ("parallel", "parallel", "arbitrary")
        scratch_note = True
    del scratch_note

    call = pl.pallas_call(
        kernel,
        out_shape=jax.ShapeDtypeStruct((N, HW, Coutp), out_dtype),
        grid_spec=grid_spec,
        compiler_params=pltpu.CompilerParams(
            dimension_semantics=dims, vmem_limit_bytes=VMEM_LIMIT),
        cost_estimate=cost,
    )
    return jax.jit(call)


def conv3x3_bn_relu(x, w_packed, bias_packed, *, relu=True,
                    out_dtype=jnp.bfloat16):
    """x: (N, H, W, Cinp) NHWC bf16, channels already zero-padded to Cinp."""
    N, H, W, Cinp = x.shape
    taps, cinp_w, Coutp = w_packed.shape
    assert taps == 9 and cinp_w == Cinp
    xp = jnp.pad(x.astype(jnp.bfloat16), ((0, 0), (1, 1), (1, 1), (0, 0)))
    tn = _pick(Coutp, (256, 128))
    tk = _pick(Cinp, (512, 256, 128))
    call = _build_conv3x3(N, H, W, Cinp, Coutp, tn, tk, bool(relu),
                          jnp.dtype(out_dtype).name)
    out = call(xp, w_packed, bias_packed)           # (N, H*W, Coutp)
    return out.reshape(N, H, W, Coutp)


# --------------------------------------------------------------------------
# ConvTranspose2d(kernel=2, stride=2) as one matmul + pixel shuffle (NHWC)
# --------------------------------------------------------------------------
def conv_transpose_2x2(x, w_packed, bias_packed, cout):
    N, H, W, Cin = x.shape
    a = x.reshape(N * H * W, Cin)
    out = matmul_bias(a, w_packed, bias_packed, relu=False,
                      out_dtype=jnp.bfloat16)        # (N*H*W, pad(4*cout))
    out = out[:, :4 * cout].reshape(N, H, W, 2, 2, cout)
    out = out.transpose(0, 1, 3, 2, 4, 5).reshape(N, 2 * H, 2 * W, cout)
    return out


# --------------------------------------------------------------------------
# UpBlockForUNetWithResNet50 forward (NCHW in / NCHW out)
# --------------------------------------------------------------------------
def up_block_forward(up_x, down_x, params):
    # single layout change at the block boundary: NCHW -> NHWC (channels=lanes)
    up = jnp.transpose(up_x, (0, 2, 3, 1)).astype(jnp.bfloat16)
    down = jnp.transpose(down_x, (0, 2, 3, 1)).astype(jnp.bfloat16)

    x = conv_transpose_2x2(up, params['up_w'], params['up_b'],
                           params['up_cout'])
    x = jnp.concatenate([x, down], axis=-1)          # channel concat on lanes

    cb1, cb2 = params['cb1'], params['cb2']
    cinp1 = cb1['w'].shape[1]
    x = jnp.pad(x, ((0, 0), (0, 0), (0, 0), (0, cinp1 - x.shape[-1])))
    x = conv3x3_bn_relu(x, cb1['w'], cb1['b'], relu=True,
                        out_dtype=jnp.bfloat16)
    # cb1's padded output channels are exactly zero (zero weight cols/bias +
    # ReLU) and round_up(cb1.cout) == round_up(cb2.cin), so feed straight in.
    x = conv3x3_bn_relu(x, cb2['w'], cb2['b'], relu=True,
                        out_dtype=jnp.float32)
    x = x[..., :cb2['cout']]
    return jnp.transpose(x, (0, 3, 1, 2))


# --------------------------------------------------------------------------
# Deterministic synthetic parameters, pre-packed for the kernels
# --------------------------------------------------------------------------
class ParamGen:
    def __init__(self, seed):
        self._key = jax.random.PRNGKey(seed)

    def _next(self):
        self._key, sub = jax.random.split(self._key)
        return sub

    def conv_w(self, cout, cin, kh, kw):
        std = (2.0 / (cin * kh * kw)) ** 0.5
        return std * jax.random.normal(self._next(), (cout, cin, kh, kw),
                                       jnp.float32)

    def convt_w(self, cin, cout, kh, kw):
        std = (2.0 / (cin * kh * kw)) ** 0.5
        return std * jax.random.normal(self._next(), (cin, cout, kh, kw),
                                       jnp.float32)

    def vec(self, c, scale=0.02):
        return scale * jax.random.normal(self._next(), (c,), jnp.float32)

    def bn(self, c):
        gamma = 1.0 + 0.1 * jax.random.normal(self._next(), (c,), jnp.float32)
        beta = 0.1 * jax.random.normal(self._next(), (c,), jnp.float32)
        mean = 0.1 * jax.random.normal(self._next(), (c,), jnp.float32)
        var = 0.5 + jax.random.uniform(self._next(), (c,), jnp.float32)
        return gamma, beta, mean, var


def make_up_block_params(in_channels, out_channels,
                         up_conv_in_channels=None, up_conv_out_channels=None,
                         seed=0):
    # TODO(synk): no pretrained checkpoint is loaded; parameters are
    # deterministic synthetic values with the exact PyTorch module shapes.
    # TODO(synk): BatchNorm uses eval-mode running statistics (folded into the
    # conv weights/bias); training-mode batch statistics are not implemented.
    if up_conv_in_channels is None:
        up_conv_in_channels = in_channels
    if up_conv_out_channels is None:
        up_conv_out_channels = out_channels
    pg = ParamGen(seed)

    # --- ConvTranspose2d(up_in, up_out, kernel_size=2, stride=2) ---
    wt = pg.convt_w(up_conv_in_channels, up_conv_out_channels, 2, 2)
    bt = pg.vec(up_conv_out_channels)
    kp = _round_up(up_conv_in_channels, LANE)
    np_ = _round_up(4 * up_conv_out_channels, LANE)
    # columns ordered (kh, kw, cout): B[ci, (kh*2+kw)*cout + co] = wt[ci, co, kh, kw]
    wt_mat = wt.transpose(0, 2, 3, 1).reshape(up_conv_in_channels,
                                              4 * up_conv_out_channels)
    wt_packed = jnp.pad(wt_mat, ((0, kp - up_conv_in_channels),
                                 (0, np_ - 4 * up_conv_out_channels))
                        ).astype(jnp.bfloat16)
    bt_packed = jnp.pad(jnp.tile(bt, 4),
                        (0, np_ - 4 * up_conv_out_channels)
                        ).reshape(1, np_).astype(jnp.float32)

    def conv_block(cin, cout):
        # Conv2d(cin, cout, 3, padding=1, bias=True) + BatchNorm2d (eval mode)
        w = pg.conv_w(cout, cin, 3, 3)
        b = pg.vec(cout)
        gamma, beta, mean, var = pg.bn(cout)
        scale = gamma * jax.lax.rsqrt(var + BN_EPS)
        bias = beta + (b - mean) * scale
        cinp, coutp = _round_up(cin, LANE), _round_up(cout, LANE)
        # (cout, cin, 3, 3) -> (9, cin, cout) with BN scale folded into columns
        wp = (w * scale[:, None, None, None]).transpose(2, 3, 1, 0)
        wp = wp.reshape(9, cin, cout)
        wp = jnp.pad(wp, ((0, 0), (0, cinp - cin), (0, coutp - cout))
                     ).astype(jnp.bfloat16)
        bp = jnp.pad(bias, (0, coutp - cout)).reshape(1, coutp).astype(jnp.float32)
        return {'w': wp, 'b': bp, 'cin': cin, 'cout': cout}

    return {
        'up_w': wt_packed, 'up_b': bt_packed, 'up_cout': up_conv_out_channels,
        'cb1': conv_block(in_channels, out_channels),
        'cb2': conv_block(out_channels, out_channels),
    }


if __name__ == "__main__":
    key = jax.random.PRNGKey(0)
    k_up, k_down = jax.random.split(key)

    batch = 2
    in_channels, out_channels = 32, 16        # concat channels -> out channels
    up_conv_in, up_conv_out = 32, 16          # ConvTranspose2d channels
    h = w = 8                                 # up_x spatial; down_x is 2h x 2w

    up_x = jax.random.normal(k_up, (batch, up_conv_in, h, w), jnp.float32)
    down_x = jax.random.normal(
        k_down, (batch, in_channels - up_conv_out, 2 * h, 2 * w), jnp.float32)

    params = make_up_block_params(in_channels, out_channels,
                                  up_conv_in, up_conv_out, seed=0)
    fwd = jax.jit(functools.partial(up_block_forward, params=params))
    out = jax.block_until_ready(fwd(up_x, down_x))

    assert out.shape == (batch, out_channels, 2 * h, 2 * w), out.shape
    assert bool(jnp.all(jnp.isfinite(out)))
    print("KERNEL_OK")
</pallas_src>

<mosaic_0001>
module attributes {stable_mosaic.version = 11 : i64} {
  func.func @kernel(%arg0: i32, %arg1: i32, %arg2: memref<128x128xbf16, #tpu.memory_space<vmem>>, %arg3: memref<128x128xbf16, #tpu.memory_space<vmem>>, %arg4: memref<1x128xf32, #tpu.memory_space<vmem>>, %arg5: memref<128x128xbf16, #tpu.memory_space<vmem>>) attributes {dimension_semantics = [#tpu.dimension_semantics<parallel>, #tpu.dimension_semantics<parallel>], iteration_bounds = array<i64: 1, 1>, scalar_prefetch = 0 : i64, scratch_operands = 0 : i64, tpu.core_type = #tpu.core_type<tc>, window_params = [{transform_indices = @transform_0, window_bounds = array<i64: 128, 128>}, {transform_indices = @transform_1, window_bounds = array<i64: 128, 128>}, {transform_indices = @transform_2, window_bounds = array<i64: 1, 128>}, {transform_indices = @transform_3, window_bounds = array<i64: 128, 128>}]} {
    %c0 = arith.constant 0 : index
    %c0_0 = arith.constant 0 : index
    %0 = vector.load %arg2[%c0, %c0_0] : memref<128x128xbf16, #tpu.memory_space<vmem>>, vector<128x128xbf16>
    %c0_1 = arith.constant 0 : index
    %c0_2 = arith.constant 0 : index
    %1 = vector.load %arg3[%c0_1, %c0_2] : memref<128x128xbf16, #tpu.memory_space<vmem>>, vector<128x128xbf16>
    %cst = arith.constant dense<0.000000e+00> : vector<128x128xf32>
    %2 = tpu.matmul %0, %1, %cst {dimension_numbers = #tpu.dot_dimension_numbers<[1], [0], [0], [1], [0, 0, 1, 1], [], []>} : vector<128x128xbf16>, vector<128x128xbf16>, vector<128x128xf32> -> vector<128x128xf32>
    %c0_3 = arith.constant 0 : index
    %c0_4 = arith.constant 0 : index
    %3 = vector.load %arg4[%c0_3, %c0_4] : memref<1x128xf32, #tpu.memory_space<vmem>>, vector<1x128xf32>
    %4 = vector.broadcast %3 : vector<1x128xf32> to vector<128x128xf32>
    %5 = arith.addf %2, %4 : vector<128x128xf32>
    %6 = arith.truncf %5 : vector<128x128xf32> to vector<128x128xbf16>
    %c0_5 = arith.constant 0 : index
    %c0_6 = arith.constant 0 : index
    %7 = vector.load %arg5[%c0_5, %c0_6] : memref<128x128xbf16, #tpu.memory_space<vmem>>, vector<128x128xbf16>
    tpu.vector_store %arg5[%c0_5, %c0_6], %6 {strides = array<i32>} : memref<128x128xbf16, #tpu.memory_space<vmem>>, vector<128x128xbf16>,
    return
  }
  func.func @transform_0(%arg0: i32, %arg1: i32) -> (i32, i32) {
    %c0_i32 = arith.constant 0 : i32
    %c0_i32_0 = arith.constant 0 : i32
    return %arg0, %c0_i32 : i32, i32
  }
  func.func @transform_1(%arg0: i32, %arg1: i32) -> (i32, i32) {
    %c0_i32 = arith.constant 0 : i32
    %c0_i32_0 = arith.constant 0 : i32
    return %c0_i32, %arg1 : i32, i32
  }
  func.func @transform_2(%arg0: i32, %arg1: i32) -> (i32, i32) {
    %c0_i32 = arith.constant 0 : i32
    %c0_i32_0 = arith.constant 0 : i32
    return %c0_i32, %arg1 : i32, i32
  }
  func.func @transform_3(%arg0: i32, %arg1: i32) -> (i32, i32) {
    %c0_i32 = arith.constant 0 : i32
    return %arg0, %arg1 : i32, i32
  }
}

</mosaic_0001>

<bundles_post_ra>
// kernel: tpu_custom_call.1
= control target key start
LH: loop header
LB: loop body
LE: loop exit
PB: predicated region body
PF: predicated region fallthrough
CT: control target
= control target key end

     0   :  { %8 = vsyncpa [#allocation3], 0  ;;  %s751_s0 = inlined_call_operand.hbm [shape: bf16[128,128], index: 0, kind: input, shape index: {}]   ;;  %s752_s1 = inlined_call_operand.hbm [shape: bf16[128,128], index: 1, kind: input, shape index: {}]   ;;  %s753_s2 = inlined_call_operand.hbm [shape: f32[1,128], index: 2, kind: input, shape index: {}]   ;;  %s754_s3 = inlined_call_operand.hbm [shape: bf16[128,128], index: 3, kind: output, shape index: {}]  }
   0x1   :  { %9 = vsyncpa [#allocation6], 0 }
   0x2   :  { %10 = vsyncpa [#allocation4], 0  ;;  %s661_s12 = smov [#allocation5]   ;;  %s662_s14 = smov [#allocation2]  }
   0x3   :  { %s28_s13 = sshll.u32 %s661_s12, 4  ;;  %s16_s15 = sshll.u32 %s662_s14, 4  ;;  %s29_s13 = int_to_ptr.vmem [resolvable:$true] %s28_s13  ;;  %s687_s15 = int_to_ptr.vmem [resolvable:$true] %s16_s15 }
   0x4   :  { %s567_s18 = scalar_lea.hbm %s752_s1, 1024 }
   0x5   :  { %p568_p0 = scmp.ne.s32.totalorder %s752_s1, %s567_s18  ;;  %p571_p1 = scmp.lt.u32.totalorder %s567_s18, %s752_s1 }
   0x7   :  { %p573_p2 = pnand %p571_p1, %p568_p0 }
   0x9   :  { %576 = shalt.err (!%p573_p2)
}
   0xa   :  { %s577_s23 = scalar_lea.vmem %s29_s13, 1024  ;;  %p582_p4 = scmp.lt.s32.totalorder %s29_s13, %s29_s13 }
   0xb   :  { %p578_p3 = scmp.ne.s32.totalorder %s29_s13, %s577_s23  ;;  %p583_p5 = scmp.lt.s32.totalorder %s577_s23, %s577_s23 }
   0xd   :  { %p584_p6 = por %p583_p5, %p582_p4 }
   0xf   :  { %p585_p7 = pnand %p584_p6, %p578_p3 }
  0x11   :  { %588 = shalt.err (!%p585_p7)
}
  0x12   :  { %s663_s24 = smov 64   ;;  %s664_s25 = smov 4  }
  0x13   :  { %34 = dma.hbm_to_vmem [thread:$0]  %s752_s1, 1024, %s29_s13, [#allocation6], %s663_s24, %s663_s24, %s664_s25  }
  0x14   :  { %s589_s30 = scalar_lea.hbm %s751_s0, 1024 }
  0x15   :  { %p590_p8 = scmp.ne.s32.totalorder %s751_s0, %s589_s30  ;;  %p593_p9 = scmp.lt.u32.totalorder %s589_s30, %s751_s0 }
  0x17   :  { %p595_p10 = pnand %p593_p9, %p590_p8 }
  0x19   :  { %598 = shalt.err (!%p595_p10)
}
  0x1a   :  { %s599_s8 = scalar_lea.vmem %s687_s15, 1024  ;;  %p604_p12 = scmp.lt.s32.totalorder %s687_s15, %s687_s15 }
  0x1b   :  { %p600_p11 = scmp.ne.s32.totalorder %s687_s15, %s599_s8  ;;  %p605_p13 = scmp.lt.s32.totalorder %s599_s8, %s599_s8 }
  0x1d   :  { %p606_p0 = por %p605_p13, %p604_p12 }
  0x1f   :  { %p607_p1 = pnand %p606_p0, %p600_p11 }
  0x21   :  { %610 = shalt.err (!%p607_p1)
}
  0x22   :  { %22 = dma.hbm_to_vmem [thread:$0]  %s751_s0, 1024, %s687_s15, [#allocation3], %s663_s24, %s663_s24, %s664_s25  }
  0x23   :  { %s665_s10 = smov [#allocation7]   ;;  %s611_s14 = scalar_lea.hbm %s753_s2, 16 }
  0x24   :  { %s41_s11 = sshll.u32 %s665_s10, 4  ;;  %p612_p2 = scmp.ne.s32.totalorder %s753_s2, %s611_s14  ;;  %s42_s11 = int_to_ptr.vmem [resolvable:$true] %s41_s11 }
  0x25   :  { %p615_p3 = scmp.lt.u32.totalorder %s611_s14, %s753_s2 }
  0x27   :  { %p617_p4 = pnand %p615_p3, %p612_p2 }
  0x29   :  { %620 = shalt.err (!%p617_p4)
}
  0x2a   :  { %s621_s20 = scalar_lea.vmem %s42_s11, 16  ;;  %s625_s0 = scalar_lea.vmem %s42_s11, 32 }
  0x2b   :  { %p622_p5 = scmp.ne.s32.totalorder %s42_s11, %s621_s20  ;;  %p626_p6 = scmp.lt.s32.totalorder %s42_s11, %s42_s11 }
  0x2c   :  { %p627_p7 = scmp.lt.s32.totalorder %s625_s0, %s621_s20 }
  0x2e   :  { %p628_p8 = por %p627_p7, %p626_p6 }
  0x30   :  { %p629_p9 = pnand %p628_p8, %p622_p5 }
  0x32   :  { %632 = shalt.err (!%p629_p9)
}
  0x33   :  { %44 = dma.hbm_to_vmem [thread:$0]  %s753_s2, 16, %s42_s11, [#allocation6]  }
  0x34   :  { %655 = dma.done.wait [#allocation3], 1024  }
  0x35   :  { %656 = vsyncadd [#allocation3], 4294966272 }
  0x36   :  { %657 = dma.done.wait [#allocation6], 1040  }
  0x37   :  { %658 = vsyncadd [#allocation6], 4294966256  ;;  %v551_v0 = vld [vmem:[#allocation5] sm:$0xff]   ;;  %v552_v1 = vld [vmem:[#allocation5 + $0x8] sm:$0xff]   ;;  %s666_s2 = smov [#allocation8]  }
  0x38   :  { %497 = vmatprep.subr.bf16.mxu0 %v551_v0  ;;  %529 = vmatprep.subr.bf16.mxu1 %v551_v0  ;;  %v553_v2 = vld [vmem:[#allocation5 + $0x10] sm:$0xff]   ;;  %v554_v3 = vld [vmem:[#allocation5 + $0x18] sm:$0xff]   ;;  %v559_v4 = vld [vmem:[#allocation2] sm:$0xff]   ;;  %s372_s22 = sshll.u32 %s666_s2, 4  ;;  %s373_s22 = int_to_ptr.vmem [resolvable:$true] %s372_s22 }
  0x39   :  { %498 = vmatpush3.bf16.msra.mxu0 %v551_v0  ;;  %537 = vmatpush3.bf16.msra.mxu1 %v551_v0  ;;  %v560_v5 = vld [vmem:[#allocation2 + $0x20] sm:$0xff]   ;;  %v556_v7 = vld [vmem:[#allocation5 + $0x28] sm:$0xff]   ;;  %v557_v8 = vld [vmem:[#allocation5 + $0x30] sm:$0xff]   ;;  %s633_s23 = scalar_lea.vmem %s373_s22, 1024  ;;  %p638_p11 = scmp.lt.s32.totalorder %s373_s22, %s373_s22 }
  0x3a   :  { %499 = vmatprep.subr.bf16.mxu0 %v552_v1  ;;  %530 = vmatprep.subr.bf16.mxu1 %v552_v1  ;;  %v555_v6 = vld [vmem:[#allocation5 + $0x20] sm:$0xff]   ;;  %v558_v9 = vld [vmem:[#allocation5 + $0x38] sm:$0xff]   ;;  %v561_v10 = vld [vmem:[#allocation2 + $0x8] sm:$0xff]   ;;  %p634_p10 = scmp.ne.s32.totalorder %s373_s22, %s633_s23  ;;  %p639_p12 = scmp.lt.s32.totalorder %s633_s23, %s633_s23 }
  0x3b   :  { %513 = vmatprep.mubr.bf16.mxu0 %v559_v4  ;;  %521 = vmatprep.mubr.bf16.mxu1 %v560_v5  ;;  %v562_v11 = vld [vmem:[#allocation2 + $0x28] sm:$0xff]   ;;  %v563_v12 = vld [vmem:[#allocation2 + $0x10] sm:$0xff]   ;;  %v565_v14 = vld [vmem:[#allocation2 + $0x18] sm:$0xff]  }
  0x3c   :  { %v564_v13 = vld [vmem:[#allocation2 + $0x30] sm:$0xff]   ;;  %v566_v15 = vld [vmem:[#allocation2 + $0x38] sm:$0xff]   ;;  %v385_v17 = vld [vmem:[#allocation7] ss:$0 sm:$0xff]  ;;  %p640_p13 = por %p639_p12, %p638_p11 }
  0x3d   :  { %500 = vmatpush3.bf16.msra.mxu0 %v552_v1  ;;  %538 = vmatpush3.bf16.msra.mxu1 %v552_v1 }
  0x3e   :  { %501 = vmatprep.subr.bf16.mxu0 %v553_v2  ;;  %531 = vmatprep.subr.bf16.mxu1 %v553_v2  ;;  %p641_p0 = pnand %p640_p13, %p634_p10 }
  0x41   :  { %502 = vmatpush3.bf16.msra.mxu0 %v553_v2  ;;  %539 = vmatpush3.bf16.msra.mxu1 %v553_v2 }
  0x42   :  { %503 = vmatprep.subr.bf16.mxu0 %v554_v3  ;;  %532 = vmatprep.subr.bf16.mxu1 %v554_v3 }
  0x45   :  { %504 = vmatpush3.bf16.msra.mxu0 %v554_v3  ;;  %540 = vmatpush3.bf16.msra.mxu1 %v554_v3 }
  0x46   :  { %505 = vmatprep.subr.bf16.mxu0 %v555_v6  ;;  %533 = vmatprep.subr.bf16.mxu1 %v555_v6 }
  0x49   :  { %506 = vmatpush3.bf16.msra.mxu0 %v555_v6  ;;  %541 = vmatpush3.bf16.msra.mxu1 %v555_v6 }
  0x4a   :  { %507 = vmatprep.subr.bf16.mxu0 %v556_v7  ;;  %534 = vmatprep.subr.bf16.mxu1 %v556_v7 }
  0x4d   :  { %508 = vmatpush3.bf16.msra.mxu0 %v556_v7  ;;  %542 = vmatpush3.bf16.msra.mxu1 %v556_v7 }
  0x4e   :  { %509 = vmatprep.subr.bf16.mxu0 %v557_v8  ;;  %535 = vmatprep.subr.bf16.mxu1 %v557_v8 }
  0x51   :  { %510 = vmatpush3.bf16.msra.mxu0 %v557_v8  ;;  %543 = vmatpush3.bf16.msra.mxu1 %v557_v8 }
  0x52   :  { %511 = vmatprep.subr.bf16.mxu0 %v558_v9  ;;  %536 = vmatprep.subr.bf16.mxu1 %v558_v9 }
  0x55   :  { %512 = vmatpush3.bf16.msra.mxu0 %v558_v9  ;;  %544 = vmatpush3.bf16.msra.mxu1 %v558_v9 }
  0x58   :  { %514 = vmatmul.mubr.bf16.vlgmr.msra.gmra.mrb[0].mxu0 %v561_v10  ;;  %522 = vmatmul.mubr.bf16.vlgmr.msra.gmra.mrb[0].mxu1 %v562_v11 }
  0x59   :  { %517 = vmatprep.mubr.bf16.mxu0 %v563_v12  ;;  %525 = vmatprep.mubr.bf16.mxu1 %v564_v13 }
  0x60   :  { %518 = vmatmul.mubr.bf16.gmra.mrb[4].mxu0 %v565_v14  ;;  %526 = vmatmul.mubr.bf16.gmra.mrb[4].mxu1 %v566_v15 }
 0x12b   :  { %v515_v16 = vpop.f32.mrb[0].mxu0  ;;  %v523_v18 = vpop.f32.mrb[0].mxu1 }
 0x12c   :  { %v224_v19 = vpop.f32.mrb[1].mxu0  ;;  %v256_v20 = vpop.f32.mrb[1].mxu1  ;;  %v233_v23 = vadd.f32 %v515_v16, %v385_v17  ;;  %v265_v24 = vadd.f32 %v523_v18, %v385_v17 }
 0x12d   :  { %v516_v21 = vpop.f32.mrb[2].mxu0  ;;  %v524_v22 = vpop.f32.mrb[2].mxu1  ;;  %v225_v29 = vadd.f32 %v385_v17, %v224_v19  ;;  %v257_v30 = vadd.f32 %v385_v17, %v256_v20 }
 0x12e   :  { %v236_v25 = vadd.f32 %v516_v21, %v385_v17  ;;  %v268_v26 = vadd.f32 %v524_v22, %v385_v17  ;;  %v227_v27 = vpop.f32.mrb[3].mxu0  ;;  %v259_v28 = vpop.f32.mrb[3].mxu1 }
 0x12f   :  { %v228_v31 = vadd.f32 %v385_v17, %v227_v27  ;;  %v260_v32 = vadd.f32 %v385_v17, %v259_v28 }
 0x130   :  { %v442_v33 = vpack.c.bf16 %v236_v25, %v233_v23  ;;  %v462_v34 = vpack.c.bf16 %v268_v26, %v265_v24 }
 0x131   :  { %v437_v35 = vpack.c.bf16 %v228_v31, %v225_v29  ;;  %v457_v36 = vpack.c.bf16 %v260_v32, %v257_v30 }
 0x132   :  { %474 = vst [vmem:[#allocation8 + $0x8] sm:$0xff] %v442_v33   ;;  %478 = vst [vmem:[#allocation8 + $0x28] sm:$0xff] %v462_v34  }
 0x133   :  { %438 = vst [vmem:[#allocation8] sm:$0xff] %v437_v35   ;;  %477 = vst [vmem:[#allocation8 + $0x20] sm:$0xff] %v457_v36   ;;  %v519_v37 = vpop.f32.mrb[4].mxu0  ;;  %v527_v38 = vpop.f32.mrb[4].mxu1 }
 0x134   :  { %v240_v39 = vpop.f32.mrb[5].mxu0  ;;  %v272_v40 = vpop.f32.mrb[5].mxu1  ;;  %v249_v43 = vadd.f32 %v519_v37, %v385_v17  ;;  %v281_v44 = vadd.f32 %v527_v38, %v385_v17 }
 0x135   :  { %v520_v41 = vpop.f32.mrb[6].mxu0  ;;  %v528_v42 = vpop.f32.mrb[6].mxu1  ;;  %v241_v49 = vadd.f32 %v385_v17, %v240_v39  ;;  %v273_v50 = vadd.f32 %v385_v17, %v272_v40 }
 0x136   :  { %v252_v45 = vadd.f32 %v520_v41, %v385_v17  ;;  %v284_v46 = vadd.f32 %v528_v42, %v385_v17  ;;  %v243_v47 = vpop.f32.mrb[7].mxu0  ;;  %v275_v48 = vpop.f32.mrb[7].mxu1 }
 0x137   :  { %v244_v51 = vadd.f32 %v385_v17, %v243_v47  ;;  %v276_v52 = vadd.f32 %v385_v17, %v275_v48 }
 0x138   :  { %v452_v53 = vpack.c.bf16 %v252_v45, %v249_v43  ;;  %v472_v54 = vpack.c.bf16 %v284_v46, %v281_v44 }
 0x139   :  { %v447_v55 = vpack.c.bf16 %v244_v51, %v241_v49  ;;  %v467_v56 = vpack.c.bf16 %v276_v52, %v273_v50 }
 0x13a   :  { %476 = vst [vmem:[#allocation8 + $0x18] sm:$0xff] %v452_v53   ;;  %480 = vst [vmem:[#allocation8 + $0x38] sm:$0xff] %v472_v54  }
 0x13b   :  { %475 = vst [vmem:[#allocation8 + $0x10] sm:$0xff] %v447_v55   ;;  %479 = vst [vmem:[#allocation8 + $0x30] sm:$0xff] %v467_v56  }
 0x13c   :  { %644 = shalt.err (!%p641_p0)
}
 0x13d   :  { %s645_s28 = scalar_lea.hbm %s754_s3, 1024 }
 0x13e   :  { %p646_p1 = scmp.ne.s32.totalorder %s754_s3, %s645_s28  ;;  %p649_p2 = scmp.lt.u32.totalorder %s645_s28, %s754_s3 }
 0x140   :  { %p651_p3 = pnand %p649_p2, %p646_p1 }
 0x142   :  { %654 = shalt.err (!%p651_p3)
}
 0x143   :  { %378 = dma.vmem_to_hbm [thread:$0]  %s373_s22, 1024, %s754_s3, [#allocation4], %s663_s24, %s663_s24, %s664_s25  }
 0x144   :  { %659 = dma.done.wait [#allocation4], 1024  }
 0x145   :  { %660 = vsyncadd [#allocation4], 4294966272 }
 0x146   :  { %382 = vsyncpa [#allocation3], 1 }
 0x147   :  { %383 = vsyncpa [#allocation6], 1 }
 0x148   :  { %384 = vsyncpa [#allocation4], 1 }

</bundles_post_ra>
